<compile_context>
chip_gen: v5e
topology: v5e:2x2
jax: 0.10.0
libtpu: 0.0.40
codegen_flags: <defaults>
</compile_context>

<pallas_src>
import jax
import jax.numpy as jnp
from jax.experimental import pallas as pl
from jax.experimental.pallas import tpu as pltpu


def _round_up(n, m):
    return ((n + m - 1) // m) * m


def _nbytes(shape, dtype):
    n = 1
    for s in shape:
        n *= int(s)
    return n * jnp.dtype(dtype).itemsize


def mlp_kernel(x_ref, w1_ref, b1_ref, w2_ref, b2_ref, w3_ref, b3_ref, o_ref):
    """Fused 3-layer MLP for one batch row tile; bf16 MXU inputs, f32 accumulation."""
    x = x_ref[...].astype(jnp.bfloat16)                 # in-kernel cast; x stays f32/narrow in HBM
    h1 = jnp.dot(x, w1_ref[...], preferred_element_type=jnp.float32) + b1_ref[...]
    h1 = jnp.maximum(h1, 0.0).astype(jnp.bfloat16)      # ReLU -> bf16 for the next MXU pass
    h2 = jnp.dot(h1, w2_ref[...], preferred_element_type=jnp.float32) + b2_ref[...]
    h2 = jnp.maximum(h2, 0.0).astype(jnp.bfloat16)
    out = jnp.dot(h2, w3_ref[...], preferred_element_type=jnp.float32) + b3_ref[...]
    o_ref[...] = out.astype(o_ref.dtype)                # narrow (tm, D_out) store


def prepare_params(params):
    """One-time weight prep (cache the result; NOT on the per-call hot path).

    Pads only the hidden dim to the 128-lane grain and casts weights to bf16.
    Zero padding is semantics-preserving: padded hidden units have zero weights and
    zero bias, ReLU(0) = 0, so they contribute nothing downstream.  The input (D_in)
    and output (D_out) dims are NOT padded: blocks whose last/second-last dim equals
    the full array dim are legal, so the kernel reads/writes only the true widths.
    """
    w1, b1, w2, b2, w3, b3 = params
    h = w1.shape[1]
    # NOTE: if H grows large enough to be MXU-bound on v6e/v7x, switch to a 256 grain
    # here (2x256x256 MXU occupancy); 128 is already optimal for v5e and for small H.
    hp = _round_up(h, 128)
    w1p = jnp.pad(w1, ((0, 0), (0, hp - h))).astype(jnp.bfloat16)        # (D_in, Hp)
    w2p = jnp.pad(w2, ((0, hp - h), (0, hp - h))).astype(jnp.bfloat16)   # (Hp, Hp)
    w3p = jnp.pad(w3, ((0, hp - h), (0, 0))).astype(jnp.bfloat16)        # (Hp, D_out)
    b1p = jnp.pad(b1, ((0, 0), (0, hp - h))).astype(jnp.float32)         # (1, Hp)
    b2p = jnp.pad(b2, ((0, 0), (0, hp - h))).astype(jnp.float32)         # (1, Hp)
    b3p = b3.astype(jnp.float32)                                         # (1, D_out)
    return (w1p, b1p, w2p, b2p, w3p, b3p)


def _batch_tiling(batch):
    """Balanced row tiles: <=~256 rows/tile, >=2 tiles when batch > one grain (v7x
    megacore), and at most one small padded tail (< tm extra rows, no ~2x waste)."""
    grain = 16
    bp = _round_up(max(batch, grain), grain)
    n = max(pl.cdiv(bp, 256), 2 if bp > grain else 1)
    tm = _round_up(pl.cdiv(bp, n), grain)
    bp = _round_up(bp, tm)
    return bp, tm, bp // tm


def neural_network_forward(x, prepared_params):
    """x: (B, D_in) float32.  prepared_params: output of prepare_params()."""
    w1, b1, w2, b2, w3, b3 = prepared_params
    B, d_in = x.shape
    hp = w1.shape[1]
    d_out = w3.shape[1]

    bp, tm, n_tiles = _batch_tiling(B)
    xp = x if bp == B else jnp.pad(x, ((0, bp - B), (0, 0)))  # rows only; no-op when aligned

    const = lambda i: (0, 0)  # grid-invariant weights/biases -> DMA'd once, never re-fetched

    # Explicit VMEM budget from the actual blocks (default 2 buffers per operand)
    # plus headroom for the f32/bf16 intermediate activations.
    blocks = [
        ((tm, d_in), x.dtype), ((d_in, hp), w1.dtype), ((1, hp), b1.dtype),
        ((hp, hp), w2.dtype), ((1, hp), b2.dtype), ((hp, d_out), w3.dtype),
        ((1, d_out), b3.dtype), ((tm, d_out), jnp.float32),
    ]
    vmem_limit = 2 * sum(_nbytes(s, d) for s, d in blocks) + 8 * tm * hp * 4
    vmem_limit = int(min(max(vmem_limit, 4 << 20), 128 << 20))

    out = pl.pallas_call(
        mlp_kernel,
        out_shape=jax.ShapeDtypeStruct((bp, d_out), jnp.float32),
        grid=(n_tiles,),
        in_specs=[
            pl.BlockSpec((tm, d_in), lambda i: (i, 0)),   # x tile (narrow, f32)
            pl.BlockSpec((d_in, hp), const),              # W1
            pl.BlockSpec((1, hp), const),                 # b1
            pl.BlockSpec((hp, hp), const),                # W2
            pl.BlockSpec((1, hp), const),                 # b2
            pl.BlockSpec((hp, d_out), const),             # W3
            pl.BlockSpec((1, d_out), const),              # b3
        ],
        out_specs=pl.BlockSpec((tm, d_out), lambda i: (i, 0)),
        compiler_params=pltpu.CompilerParams(
            dimension_semantics=("parallel",),
            vmem_limit_bytes=vmem_limit,
        ),
    )(xp, w1, b1, w2, b2, w3, b3)

    return out if bp == B else out[:B]


def init_params(key, inputs, hidden, outputs):
    """Deterministic init mimicking PyTorch nn.Linear: U(-1/sqrt(fan_in), 1/sqrt(fan_in)).
    Weights stored as (in, out) == PyTorch weight.T."""
    ks = jax.random.split(key, 6)

    def lin(kw, kb, fan_in, fan_out):
        bound = 1.0 / jnp.sqrt(float(fan_in))
        w = jax.random.uniform(kw, (fan_in, fan_out), jnp.float32, -bound, bound)
        b = jax.random.uniform(kb, (1, fan_out), jnp.float32, -bound, bound)
        return w, b

    w1, b1 = lin(ks[0], ks[1], inputs, hidden)
    w2, b2 = lin(ks[2], ks[3], hidden, hidden)
    w3, b3 = lin(ks[4], ks[5], hidden, outputs)
    return (w1, b1, w2, b2, w3, b3)


def reference_forward(x, params):
    w1, b1, w2, b2, w3, b3 = params
    h1 = jnp.maximum(x @ w1 + b1, 0.0)
    h2 = jnp.maximum(h1 @ w2 + b2, 0.0)
    return h2 @ w3 + b3


if __name__ == "__main__":
    INPUTS, HIDDEN, OUTPUTS = 16, 32, 8

    key = jax.random.PRNGKey(0)
    kx1, kx2, kp = jax.random.split(key, 3)
    params = init_params(kp, INPUTS, HIDDEN, OUTPUTS)
    prepared = prepare_params(params)  # one-time, outside the hot path

    # Case 1: small aligned batch -> grid=(1,), no padding, no slicing anywhere.
    x1 = jax.random.normal(kx1, (16, INPUTS), jnp.float32)
    out1 = jax.block_until_ready(neural_network_forward(x1, prepared))
    ref1 = reference_forward(x1, params)
    assert out1.shape == (16, OUTPUTS)
    # bf16 MXU inputs with f32 accumulation -> compare at bf16-level tolerance.
    assert jnp.allclose(out1, ref1, atol=2e-2, rtol=2e-2), "mismatch vs f32 reference (B=16)"

    # Case 2: ragged batch -> balanced 2-tile "parallel" grid with a small padded tail.
    x2 = jax.random.normal(kx2, (40, INPUTS), jnp.float32)
    out2 = jax.block_until_ready(neural_network_forward(x2, prepared))
    ref2 = reference_forward(x2, params)
    assert out2.shape == (40, OUTPUTS)
    assert jnp.allclose(out2, ref2, atol=2e-2, rtol=2e-2), "mismatch vs f32 reference (B=40)"

    print("KERNEL_OK")
</pallas_src>

<mosaic_0001>
module attributes {stable_mosaic.version = 11 : i64} {
  func.func @mlp_kernel(%arg0: i32, %arg1: memref<16x16xf32, #tpu.memory_space<vmem>>, %arg2: memref<16x128xbf16, #tpu.memory_space<vmem>>, %arg3: memref<1x128xf32, #tpu.memory_space<vmem>>, %arg4: memref<128x128xbf16, #tpu.memory_space<vmem>>, %arg5: memref<1x128xf32, #tpu.memory_space<vmem>>, %arg6: memref<128x8xbf16, #tpu.memory_space<vmem>>, %arg7: memref<1x8xf32, #tpu.memory_space<vmem>>, %arg8: memref<16x8xf32, #tpu.memory_space<vmem>>) attributes {dimension_semantics = [#tpu.dimension_semantics<parallel>], iteration_bounds = array<i64: 1>, scalar_prefetch = 0 : i64, scratch_operands = 0 : i64, tpu.core_type = #tpu.core_type<tc>, window_params = [{transform_indices = @transform_0, window_bounds = array<i64: 16, 16>}, {pipeline_mode = #tpu.pipeline_mode<synchronous>, transform_indices = @transform_1, window_bounds = array<i64: 16, 128>}, {pipeline_mode = #tpu.pipeline_mode<synchronous>, transform_indices = @transform_2, window_bounds = array<i64: 1, 128>}, {pipeline_mode = #tpu.pipeline_mode<synchronous>, transform_indices = @transform_3, window_bounds = array<i64: 128, 128>}, {pipeline_mode = #tpu.pipeline_mode<synchronous>, transform_indices = @transform_4, window_bounds = array<i64: 1, 128>}, {pipeline_mode = #tpu.pipeline_mode<synchronous>, transform_indices = @transform_5, window_bounds = array<i64: 128, 8>}, {pipeline_mode = #tpu.pipeline_mode<synchronous>, transform_indices = @transform_6, window_bounds = array<i64: 1, 8>}, {transform_indices = @transform_7, window_bounds = array<i64: 16, 8>}]} {
    %c0 = arith.constant 0 : index
    %c0_0 = arith.constant 0 : index
    %0 = vector.load %arg1[%c0, %c0_0] : memref<16x16xf32, #tpu.memory_space<vmem>>, vector<16x16xf32>
    %1 = arith.truncf %0 : vector<16x16xf32> to vector<16x16xbf16>
    %c0_1 = arith.constant 0 : index
    %c0_2 = arith.constant 0 : index
    %2 = vector.load %arg2[%c0_1, %c0_2] : memref<16x128xbf16, #tpu.memory_space<vmem>>, vector<16x128xbf16>
    %cst = arith.constant dense<0.000000e+00> : vector<16x128xf32>
    %3 = tpu.matmul %1, %2, %cst {dimension_numbers = #tpu.dot_dimension_numbers<[1], [0], [0], [1], [0, 0, 1, 1], [], []>} : vector<16x16xbf16>, vector<16x128xbf16>, vector<16x128xf32> -> vector<16x128xf32>
    %c0_3 = arith.constant 0 : index
    %c0_4 = arith.constant 0 : index
    %4 = vector.load %arg3[%c0_3, %c0_4] : memref<1x128xf32, #tpu.memory_space<vmem>>, vector<1x128xf32>
    %5 = vector.broadcast %4 : vector<1x128xf32> to vector<16x128xf32>
    %6 = arith.addf %3, %5 : vector<16x128xf32>
    %cst_5 = arith.constant 0.000000e+00 : f32
    %7 = vector.broadcast %cst_5 : f32 to vector<16x128xf32>
    %8 = arith.maximumf %6, %7 : vector<16x128xf32>
    %9 = arith.truncf %8 : vector<16x128xf32> to vector<16x128xbf16>
    %c0_6 = arith.constant 0 : index
    %c0_7 = arith.constant 0 : index
    %10 = vector.load %arg4[%c0_6, %c0_7] : memref<128x128xbf16, #tpu.memory_space<vmem>>, vector<128x128xbf16>
    %cst_8 = arith.constant dense<0.000000e+00> : vector<16x128xf32>
    %11 = tpu.matmul %9, %10, %cst_8 {dimension_numbers = #tpu.dot_dimension_numbers<[1], [0], [0], [1], [0, 0, 1, 1], [], []>} : vector<16x128xbf16>, vector<128x128xbf16>, vector<16x128xf32> -> vector<16x128xf32>
    %c0_9 = arith.constant 0 : index
    %c0_10 = arith.constant 0 : index
    %12 = vector.load %arg5[%c0_9, %c0_10] : memref<1x128xf32, #tpu.memory_space<vmem>>, vector<1x128xf32>
    %13 = vector.broadcast %12 : vector<1x128xf32> to vector<16x128xf32>
    %14 = arith.addf %11, %13 : vector<16x128xf32>
    %cst_11 = arith.constant 0.000000e+00 : f32
    %15 = vector.broadcast %cst_11 : f32 to vector<16x128xf32>
    %16 = arith.maximumf %14, %15 : vector<16x128xf32>
    %17 = arith.truncf %16 : vector<16x128xf32> to vector<16x128xbf16>
    %c0_12 = arith.constant 0 : index
    %c0_13 = arith.constant 0 : index
    %18 = vector.load %arg6[%c0_12, %c0_13] : memref<128x8xbf16, #tpu.memory_space<vmem>>, vector<128x8xbf16>
    %cst_14 = arith.constant dense<0.000000e+00> : vector<16x8xf32>
    %19 = tpu.matmul %17, %18, %cst_14 {dimension_numbers = #tpu.dot_dimension_numbers<[1], [0], [0], [1], [0, 0, 1, 1], [], []>} : vector<16x128xbf16>, vector<128x8xbf16>, vector<16x8xf32> -> vector<16x8xf32>
    %c0_15 = arith.constant 0 : index
    %c0_16 = arith.constant 0 : index
    %20 = vector.load %arg7[%c0_15, %c0_16] : memref<1x8xf32, #tpu.memory_space<vmem>>, vector<1x8xf32>
    %21 = vector.broadcast %20 : vector<1x8xf32> to vector<16x8xf32>
    %22 = arith.addf %19, %21 : vector<16x8xf32>
    %c0_17 = arith.constant 0 : index
    %c0_18 = arith.constant 0 : index
    %23 = vector.load %arg8[%c0_17, %c0_18] : memref<16x8xf32, #tpu.memory_space<vmem>>, vector<16x8xf32>
    tpu.vector_store %arg8[%c0_17, %c0_18], %22 {strides = array<i32>} : memref<16x8xf32, #tpu.memory_space<vmem>>, vector<16x8xf32>,
    return
  }
  func.func @transform_0(%arg0: i32) -> (i32, i32) {
    %c0_i32 = arith.constant 0 : i32
    %c0_i32_0 = arith.constant 0 : i32
    return %arg0, %c0_i32 : i32, i32
  }
  func.func @transform_1(%arg0: i32) -> (i32, i32) {
    %c0_i32 = arith.constant 0 : i32
    %c0_i32_0 = arith.constant 0 : i32
    %c0_i32_1 = arith.constant 0 : i32
    return %c0_i32, %c0_i32_0 : i32, i32
  }
  func.func @transform_2(%arg0: i32) -> (i32, i32) {
    %c0_i32 = arith.constant 0 : i32
    %c0_i32_0 = arith.constant 0 : i32
    %c0_i32_1 = arith.constant 0 : i32
    return %c0_i32, %c0_i32_0 : i32, i32
  }
  func.func @transform_3(%arg0: i32) -> (i32, i32) {
    %c0_i32 = arith.constant 0 : i32
    %c0_i32_0 = arith.constant 0 : i32
    %c0_i32_1 = arith.constant 0 : i32
    return %c0_i32, %c0_i32_0 : i32, i32
  }
  func.func @transform_4(%arg0: i32) -> (i32, i32) {
    %c0_i32 = arith.constant 0 : i32
    %c0_i32_0 = arith.constant 0 : i32
    %c0_i32_1 = arith.constant 0 : i32
    return %c0_i32, %c0_i32_0 : i32, i32
  }
  func.func @transform_5(%arg0: i32) -> (i32, i32) {
    %c0_i32 = arith.constant 0 : i32
    %c0_i32_0 = arith.constant 0 : i32
    %c0_i32_1 = arith.constant 0 : i32
    return %c0_i32, %c0_i32_0 : i32, i32
  }
  func.func @transform_6(%arg0: i32) -> (i32, i32) {
    %c0_i32 = arith.constant 0 : i32
    %c0_i32_0 = arith.constant 0 : i32
    %c0_i32_1 = arith.constant 0 : i32
    return %c0_i32, %c0_i32_0 : i32, i32
  }
  func.func @transform_7(%arg0: i32) -> (i32, i32) {
    %c0_i32 = arith.constant 0 : i32
    %c0_i32_0 = arith.constant 0 : i32
    return %arg0, %c0_i32 : i32, i32
  }
}

</mosaic_0001>

<bundles_post_ra>
// kernel: tpu_custom_call.1
= control target key start
LH: loop header
LB: loop body
LE: loop exit
PB: predicated region body
PF: predicated region fallthrough
CT: control target
= control target key end

     0   :  { %12 = vsyncpa [#allocation3], 0  ;;  %s533_s0 = inlined_call_operand.hbm [shape: f32[16,16], index: 0, kind: input, shape index: {}]   ;;  %s534_s1 = inlined_call_operand.hbm [shape: bf16[16,128], index: 1, kind: input, shape index: {}]   ;;  %s535_s2 = inlined_call_operand.vmem [shape: f32[1,128], index: 2, kind: input, shape index: {}]   ;;  %s536_s3 = inlined_call_operand.vmem [shape: bf16[128,128], index: 3, kind: input, shape index: {}]   ;;  %s537_s4 = inlined_call_operand.vmem [shape: f32[1,128], index: 4, kind: input, shape index: {}]   ;;  %s538_s5 = inlined_call_operand.vmem [shape: bf16[128,8], index: 5, kind: input, shape index: {}]   ;;  %s539_s6 = inlined_call_operand.vmem [shape: f32[1,8], index: 6, kind: input, shape index: {}]   ;;  %s540_s7 = inlined_call_operand.vmem [shape: f32[16,8], index: 7, kind: output, shape index: {}]  }
   0x1   :  { %s18_s26 = sshll.u32 %s533_s0, 4  ;;  %s19_s26 = int_to_ptr.hbm [resolvable:$true] %s18_s26 }
   0x2   :  { %13 = vsyncpa [#allocation5], 0  ;;  %s418_s27 = smov [#allocation2]   ;;  %s31_s8 = sshll.u32 %s534_s1, 4  ;;  %s32_s8 = int_to_ptr.hbm [resolvable:$true] %s31_s8 }
   0x3   :  { %s20_s28 = sshll.u32 %s418_s27, 4  ;;  %s419_s9 = smov 128   ;;  %s21_s28 = int_to_ptr.vmem [resolvable:$true] %s20_s28 }
   0x4   :  { %s420_s10 = smov 8   ;;  %s421_s11 = smov [#allocation4]  }
   0x5   :  { %26 = dma.hbm_to_vmem [thread:$0]  %s19_s26, 256, %s21_s28, [#allocation3], %s419_s9, %s419_s9, %s420_s10  }
   0x6   :  { %s33_s12 = sshll.u32 %s421_s11, 4  ;;  %s422_s13 = smov 64   ;;  %s34_s12 = int_to_ptr.vmem [resolvable:$true] %s33_s12 }
   0x7   :  { %s423_s14 = smov 4  }
   0x8   :  { %39 = dma.hbm_to_vmem [thread:$0]  %s32_s8, 128, %s34_s12, [#allocation5], %s422_s13, %s422_s13, %s423_s14  }
   0x9   :  { %414 = dma.done.wait [#allocation3], 256  }
   0xa   :  { %415 = vsyncadd [#allocation3], 4294967040 }
   0xb   :  { %416 = dma.done.wait [#allocation5], 128  }
   0xc   :  { %417 = vsyncadd [#allocation5], 4294967168  ;;  %v340_v0 = vld [vmem:[#allocation4] sm:$0xff]  ;;  %v59_v1 = vld [vmem:[#allocation2] sm:$0xff]  ;;  %vm74_vm0 = vcmask 130048   ;;  %vm262_vm1 = vcmask 64512  }
   0xd   :  { %v60_v2 = vld [vmem:[#allocation2 + $0x8] sm:$0xff]  ;;  %v348_v4 = vld [vmem:[%s536_s3 + $0x38] sm:$0xff]  ;;  %85 = vmatpush.bf16.msra.mxu0 %v340_v0  ;;  %v347_v5 = vld [vmem:[%s536_s3 + $0x30] sm:$0xff] }
   0xe   :  { %v61_v3 = vpack.c.bf16 %v60_v2, %v59_v1  ;;  %163 = vmatpush.bf16.msra.mxu1 %v348_v4  ;;  %v346_v6 = vld [vmem:[%s536_s3 + $0x28] sm:$0xff]  ;;  %v345_v7 = vld [vmem:[%s536_s3 + $0x20] sm:$0xff]  ;;  %v344_v8 = vld [vmem:[%s536_s3 + $0x18] sm:$0xff] }
   0xf   :  { %v343_v9 = vld [vmem:[%s536_s3 + $0x10] sm:$0xff]  ;;  %v342_v10 = vld [vmem:[%s536_s3 + $0x8] sm:$0xff]  ;;  %v341_v11 = vld [vmem:[%s536_s3] sm:$0xff] }
  0x10   :  { %275 = vmatmul.msk.bf16.vlgmr.msra.gmra.mxu0 %vm74_vm0, %v61_v3  ;;  %v356_v12 = vld [vmem:[%s538_s5 + $0x38] sm:$0xff]  ;;  %v355_v13 = vld [vmem:[%s538_s5 + $0x30] sm:$0xff]  ;;  %v354_v14 = vld [vmem:[%s538_s5 + $0x28] sm:$0xff] }
  0x11   :  { %248 = vmatpush.bf16.msra.mxu2 %v356_v12  ;;  %v353_v15 = vld [vmem:[%s538_s5 + $0x20] sm:$0xff]  ;;  %v352_v24 = vld [vmem:[%s538_s5 + $0x18] sm:$0xff]  ;;  %v351_v25 = vld [vmem:[%s538_s5 + $0x10] sm:$0xff] }
  0x12   :  { %164 = vmatpush.bf16.msra.mxu1 %v347_v5  ;;  %v363_v17 = vld [vmem:[%s535_s2] ss:$0 sm:$0xff]  ;;  %v350_v26 = vld [vmem:[%s538_s5 + $0x8] sm:$0xff] }
  0x13   :  { %v349_v27 = vld [vmem:[%s538_s5] sm:$0xff] }
  0x14   :  { %v364_v29 = vld [vmem:[%s537_s4] ss:$0 sm:$0xff] }
  0x15   :  { %249 = vmatpush.bf16.msra.mxu2 %v355_v13  ;;  %v365_v36 = vld [vmem:[%s539_s6] ss:$0 sm:$0xff] }
  0x16   :  { %165 = vmatpush.bf16.msra.mxu1 %v346_v6 }
  0x19   :  { %250 = vmatpush.bf16.msra.mxu2 %v354_v14 }
  0x1a   :  { %166 = vmatpush.bf16.msra.mxu1 %v345_v7 }
  0x1d   :  { %251 = vmatpush.bf16.msra.mxu2 %v353_v15 }
  0x1e   :  { %167 = vmatpush.bf16.msra.mxu1 %v344_v8 }
  0x21   :  { %252 = vmatpush.bf16.msra.mxu2 %v352_v24 }
  0x22   :  { %168 = vmatpush.bf16.msra.mxu1 %v343_v9 }
  0x25   :  { %253 = vmatpush.bf16.msra.mxu2 %v351_v25 }
  0x26   :  { %169 = vmatpush.bf16.msra.mxu1 %v342_v10 }
  0x29   :  { %254 = vmatpush.bf16.msra.mxu2 %v350_v26 }
  0x2a   :  { %170 = vmatpush.bf16.msra.mxu1 %v341_v11 }
  0x2d   :  { %255 = vmatpush.bf16.msra.mxu2 %v349_v27 }
  0x8d   :  { %v87_v16 = vpop.f32.mrf.mxu0 }
  0x8e   :  { %v88_v18 = vadd.f32 %v363_v17, %v87_v16 }
  0x90   :  { %v92_v21 = vmax.f32 %v88_v18, 0.0 }
  0x95   :  { %v89_v19 = vpop.f32.mrf.mxu0 }
  0x96   :  { %v90_v20 = vadd.f32 %v363_v17, %v89_v19 }
  0x98   :  { %v93_v22 = vmax.f32 %v90_v20, 0.0 }
  0x9a   :  { %v94_v23 = vpack.c.bf16 %v93_v22, %v92_v21 }
  0x9c   :  { %171 = vmatmul.bf16.vlgmr.msra.gmra.mxu1 %v94_v23 }
 0x119   :  { %v172_v28 = vpop.f32.mrf.mxu1 }
 0x11a   :  { %v173_v30 = vadd.f32 %v364_v29, %v172_v28 }
 0x11c   :  { %v177_v33 = vmax.f32 %v173_v30, 0.0 }
 0x121   :  { %v174_v31 = vpop.f32.mrf.mxu1 }
 0x122   :  { %v175_v32 = vadd.f32 %v364_v29, %v174_v31 }
 0x124   :  { %v178_v34 = vmax.f32 %v175_v32, 0.0 }
 0x126   :  { %v179_v35 = vpack.c.bf16 %v178_v34, %v177_v33 }
 0x128   :  { %256 = vmatmul.bf16.vlgmr.msra.gmra.mxu2 %v179_v35 }
 0x1ab   :  { %v257_v37 = vpop.f32.mrf.mxu2 }
 0x1ac   :  { %v258_v38 = vadd.f32 %v365_v36, %v257_v37 }
 0x1ae   :  { %263 = vst.msk [vmem:[%s540_s7] sm:$0xff] %vm262_vm1, %v258_v38 }
 0x1b3   :  { %v259_v39 = vpop.f32.mrf.mxu2 }
 0x1b4   :  { %v260_v40 = vadd.f32 %v365_v36, %v259_v39 }
 0x1b6   :  { %264 = vst.msk [vmem:[%s540_s7 + $0x8] sm:$0xff] %vm262_vm1, %v260_v40 }
 0x1b7   :  { %269 = vsyncpa [#allocation3], 1 }
 0x1b8   :  { %270 = vsyncpa [#allocation5], 1 }

</bundles_post_ra>
